<compile_context>
chip_gen: v5e
topology: v5e:2x2
jax: 0.10.0
libtpu: 0.0.40
codegen_flags: <defaults>
</compile_context>

<pallas_src>
import functools

import jax
import jax.numpy as jnp
from jax.experimental import pallas as pl
from jax.experimental.pallas import tpu as pltpu


def _round_up(n, m):
    return ((n + m - 1) // m) * m


def _ae_kernel(x_ref, w_enc_ref, w_dec_ref, b_ref, out_ref, *, comp_pad):
    # Encoder: Linear(data_dim -> compression_dim) + Sigmoid.
    # bf16 operands on the MXU, f32 accumulation; elementwise work stays in f32.
    z = jnp.dot(x_ref[...], w_enc_ref[...], preferred_element_type=jnp.float32)
    z = jax.nn.sigmoid(z + b_ref[:, :comp_pad])          # (TB, CP) + (1, CP)
    # Decoder: Linear(compression_dim -> data_dim), no activation.
    y = jnp.dot(z.astype(jnp.bfloat16), w_dec_ref[...],
                preferred_element_type=jnp.float32)
    out_ref[...] = (y + b_ref[:, comp_pad:]).astype(out_ref.dtype)  # lane-dense store


def prepare_params(w_enc, b_enc, w_dec, b_dec):
    """Pad (to 128-lane multiples) and cast the constant parameters ONCE.

    w_enc: (data_dim, comp), b_enc: (1, comp) or (comp,),
    w_dec: (comp, data_dim), b_dec: (1, data_dim) or (data_dim,).
    Returns a tuple consumed by `autoencoder_1layer_forward`.
    """
    D, C = w_enc.shape
    DP, CP = _round_up(D, 128), _round_up(C, 128)
    bf16 = jnp.bfloat16
    # Built directly in bf16 (no f32 temporaries); zero padding is exact.
    w_enc_p = jnp.zeros((DP, CP), bf16).at[:D, :C].set(w_enc.astype(bf16))
    w_dec_p = jnp.zeros((CP, DP), bf16).at[:C, :D].set(w_dec.astype(bf16))
    # Both biases in one (1, CP+DP) f32 array -> a single tiny constant DMA.
    b_all = jnp.zeros((1, CP + DP), jnp.float32)
    b_all = b_all.at[:, :C].set(jnp.reshape(b_enc, (1, C)).astype(jnp.float32))
    b_all = b_all.at[:, CP:CP + D].set(jnp.reshape(b_dec, (1, D)).astype(jnp.float32))
    return (w_enc_p, w_dec_p, b_all, D, C)


def _choose_batch_tile(B, max_batch_tile):
    # bf16 packs 16 rows per vreg -> keep the tile a multiple of 16.
    b16 = _round_up(max(B, 16), 16)
    if b16 > max_batch_tile:
        return max_batch_tile
    if b16 >= 256:
        # Split into >= 2 grid steps so the "parallel" batch axis can actually
        # be sharded across v7x's two TensorCores.
        return _round_up((b16 + 1) // 2, 16)
    return b16


def autoencoder_1layer_forward(x, params, *, max_batch_tile=512, out_dtype=None):
    """x: (B, data_dim) -> (B, data_dim) == sigmoid(x @ w_enc + b_enc) @ w_dec + b_dec."""
    w_enc_p, w_dec_p, b_all, D, C = params
    B = x.shape[0]
    assert x.shape[1] == D
    DP, CP = w_enc_p.shape
    out_dtype = x.dtype if out_dtype is None else out_dtype
    out_bytes = jnp.dtype(out_dtype).itemsize

    TB = _choose_batch_tile(B, max_batch_tile)
    BP = _round_up(B, TB)

    # Pad/cast x straight to bf16 (halves HBM pre-pass traffic); skip the pad
    # entirely when shapes are already aligned.
    aligned = (B == BP) and (D == DP)
    if aligned:
        x_p = x.astype(jnp.bfloat16)
    else:
        x_p = jnp.zeros((BP, DP), jnp.bfloat16).at[:B, :D].set(x.astype(jnp.bfloat16))

    # VMEM budget: double-buffered x/out tiles + single-buffered weights/biases.
    # TODO(synk): for very large D*C on v7x (64 MiB VMEM) add a second grid axis
    # tiling the decoder output dim so only a (CP, TN) slice of w_dec is resident.
    vmem_bytes = (2 * TB * DP * 2            # x tile, bf16, double-buffered
                  + 2 * TB * DP * out_bytes  # out tile, double-buffered
                  + DP * CP * 2              # w_enc, bf16, single-buffered
                  + CP * DP * 2              # w_dec, bf16, single-buffered
                  + 8 * (CP + DP) * 4)       # biases (sublane-padded), single-buffered
    vmem_limit = int(min(vmem_bytes + (2 << 20), 100 << 20))

    out = pl.pallas_call(
        functools.partial(_ae_kernel, comp_pad=CP),
        out_shape=jax.ShapeDtypeStruct((BP, DP), out_dtype),
        grid=(BP // TB,),
        in_specs=[
            pl.BlockSpec((TB, DP), lambda i: (i, 0)),                # x: batch-tiled
            pl.BlockSpec((DP, CP), lambda i: (0, 0),
                         pipeline_mode=pl.Buffered(1)),              # w_enc: resident
            pl.BlockSpec((CP, DP), lambda i: (0, 0),
                         pipeline_mode=pl.Buffered(1)),              # w_dec: resident
            pl.BlockSpec((1, CP + DP), lambda i: (0, 0),
                         pipeline_mode=pl.Buffered(1)),              # biases: resident
        ],
        out_specs=pl.BlockSpec((TB, DP), lambda i: (i, 0)),          # lane-dense store
        compiler_params=pltpu.CompilerParams(
            dimension_semantics=("parallel",),                       # megacore over batch
            vmem_limit_bytes=vmem_limit),
    )(x_p, w_enc_p, w_dec_p, b_all)

    if aligned:
        return out
    return out[:B, :D]


def autoencoder_1layer(x, w_enc, b_enc, w_dec, b_dec, **kwargs):
    """Convenience one-shot wrapper (prep + forward).  Prefer calling
    `prepare_params` once and `autoencoder_1layer_forward` per step."""
    return autoencoder_1layer_forward(x, prepare_params(w_enc, b_enc, w_dec, b_dec),
                                      **kwargs)


def _init_params(key, data_dim, compression_dim, dtype=jnp.float32):
    """Deterministic init mimicking PyTorch nn.Linear default:
       U(-1/sqrt(fan_in), 1/sqrt(fan_in)) for weights and biases."""
    k1, k2, k3, k4 = jax.random.split(key, 4)
    bound_enc = 1.0 / jnp.sqrt(jnp.float32(data_dim))
    bound_dec = 1.0 / jnp.sqrt(jnp.float32(compression_dim))
    # Stored as (in_features, out_features) == PyTorch weight transposed.
    w_enc = jax.random.uniform(k1, (data_dim, compression_dim), dtype,
                               minval=-bound_enc, maxval=bound_enc)
    b_enc = jax.random.uniform(k2, (1, compression_dim), dtype,
                               minval=-bound_enc, maxval=bound_enc)
    w_dec = jax.random.uniform(k3, (compression_dim, data_dim), dtype,
                               minval=-bound_dec, maxval=bound_dec)
    b_dec = jax.random.uniform(k4, (1, data_dim), dtype,
                               minval=-bound_dec, maxval=bound_dec)
    return w_enc, b_enc, w_dec, b_dec


if __name__ == "__main__":
    # Small shapes consistent with the module's forward: x is (batch, data_dim).
    batch = 8
    data_dim = 64
    compression_dim = 32

    key = jax.random.PRNGKey(0)
    kx, kp = jax.random.split(key)
    x = jax.random.normal(kx, (batch, data_dim), jnp.float32)
    w_enc, b_enc, w_dec, b_dec = _init_params(kp, data_dim, compression_dim)

    # Pad/cast the constant parameters once (model-load time), then run forward.
    params = prepare_params(w_enc, b_enc, w_dec, b_dec)
    out = autoencoder_1layer_forward(x, params)
    out = jax.block_until_ready(out)

    # Pure-f32 JAX reference of the PyTorch forward semantics.
    z_ref = jax.nn.sigmoid(x @ w_enc + b_enc)
    ref = z_ref @ w_dec + b_dec
    assert out.shape == (batch, data_dim)
    # bf16 MXU operands with f32 accumulation deviate from the pure-f32 reference,
    # so the tolerance is loosened (still catches layout / bias / activation bugs).
    assert jnp.allclose(out, ref, atol=5e-2, rtol=5e-2), \
        float(jnp.max(jnp.abs(out - ref)))

    print("KERNEL_OK")
</pallas_src>

<mosaic_0001>
module attributes {stable_mosaic.version = 11 : i64} {
  func.func @_ae_kernel(%arg0: i32, %arg1: memref<16x128xbf16, #tpu.memory_space<vmem>>, %arg2: memref<128x128xbf16, #tpu.memory_space<vmem>>, %arg3: memref<128x128xbf16, #tpu.memory_space<vmem>>, %arg4: memref<1x256xf32, #tpu.memory_space<vmem>>, %arg5: memref<16x128xf32, #tpu.memory_space<vmem>>) attributes {dimension_semantics = [#tpu.dimension_semantics<parallel>], iteration_bounds = array<i64: 1>, scalar_prefetch = 0 : i64, scratch_operands = 0 : i64, tpu.core_type = #tpu.core_type<tc>, window_params = [{transform_indices = @transform_0, window_bounds = array<i64: 16, 128>}, {pipeline_mode = #tpu.pipeline_mode<synchronous>, transform_indices = @transform_1, window_bounds = array<i64: 128, 128>}, {pipeline_mode = #tpu.pipeline_mode<synchronous>, transform_indices = @transform_2, window_bounds = array<i64: 128, 128>}, {pipeline_mode = #tpu.pipeline_mode<synchronous>, transform_indices = @transform_3, window_bounds = array<i64: 1, 256>}, {transform_indices = @transform_4, window_bounds = array<i64: 16, 128>}]} {
    %c0 = arith.constant 0 : index
    %c0_0 = arith.constant 0 : index
    %0 = vector.load %arg1[%c0, %c0_0] : memref<16x128xbf16, #tpu.memory_space<vmem>>, vector<16x128xbf16>
    %c0_1 = arith.constant 0 : index
    %c0_2 = arith.constant 0 : index
    %1 = vector.load %arg2[%c0_1, %c0_2] : memref<128x128xbf16, #tpu.memory_space<vmem>>, vector<128x128xbf16>
    %cst = arith.constant dense<0.000000e+00> : vector<16x128xf32>
    %2 = tpu.matmul %0, %1, %cst {dimension_numbers = #tpu.dot_dimension_numbers<[1], [0], [0], [1], [0, 0, 1, 1], [], []>} : vector<16x128xbf16>, vector<128x128xbf16>, vector<16x128xf32> -> vector<16x128xf32>
    %c0_3 = arith.constant 0 : index
    %c0_4 = arith.constant 0 : index
    %3 = vector.load %arg4[%c0_3, %c0_4] : memref<1x256xf32, #tpu.memory_space<vmem>>, vector<1x128xf32>
    %4 = vector.broadcast %3 : vector<1x128xf32> to vector<16x128xf32>
    %5 = arith.addf %2, %4 : vector<16x128xf32>
    %6 = arith.negf %5 : vector<16x128xf32>
    %7 = math.exp %6 : vector<16x128xf32>
    %cst_5 = arith.constant 1.000000e+00 : f32
    %8 = vector.broadcast %cst_5 : f32 to vector<16x128xf32>
    %9 = arith.addf %8, %7 : vector<16x128xf32>
    %10 = arith.divf %8, %9 : vector<16x128xf32>
    %11 = arith.truncf %10 : vector<16x128xf32> to vector<16x128xbf16>
    %c0_6 = arith.constant 0 : index
    %c0_7 = arith.constant 0 : index
    %12 = vector.load %arg3[%c0_6, %c0_7] : memref<128x128xbf16, #tpu.memory_space<vmem>>, vector<128x128xbf16>
    %cst_8 = arith.constant dense<0.000000e+00> : vector<16x128xf32>
    %13 = tpu.matmul %11, %12, %cst_8 {dimension_numbers = #tpu.dot_dimension_numbers<[1], [0], [0], [1], [0, 0, 1, 1], [], []>} : vector<16x128xbf16>, vector<128x128xbf16>, vector<16x128xf32> -> vector<16x128xf32>
    %c0_9 = arith.constant 0 : index
    %c128 = arith.constant 128 : index
    %14 = vector.load %arg4[%c0_9, %c128] : memref<1x256xf32, #tpu.memory_space<vmem>>, vector<1x128xf32>
    %15 = vector.broadcast %14 : vector<1x128xf32> to vector<16x128xf32>
    %16 = arith.addf %13, %15 : vector<16x128xf32>
    %c0_10 = arith.constant 0 : index
    %c0_11 = arith.constant 0 : index
    %17 = vector.load %arg5[%c0_10, %c0_11] : memref<16x128xf32, #tpu.memory_space<vmem>>, vector<16x128xf32>
    tpu.vector_store %arg5[%c0_10, %c0_11], %16 {strides = array<i32>} : memref<16x128xf32, #tpu.memory_space<vmem>>, vector<16x128xf32>,
    return
  }
  func.func @transform_0(%arg0: i32) -> (i32, i32) {
    %c0_i32 = arith.constant 0 : i32
    %c0_i32_0 = arith.constant 0 : i32
    return %arg0, %c0_i32 : i32, i32
  }
  func.func @transform_1(%arg0: i32) -> (i32, i32) {
    %c0_i32 = arith.constant 0 : i32
    %c0_i32_0 = arith.constant 0 : i32
    %c0_i32_1 = arith.constant 0 : i32
    return %c0_i32, %c0_i32_0 : i32, i32
  }
  func.func @transform_2(%arg0: i32) -> (i32, i32) {
    %c0_i32 = arith.constant 0 : i32
    %c0_i32_0 = arith.constant 0 : i32
    %c0_i32_1 = arith.constant 0 : i32
    return %c0_i32, %c0_i32_0 : i32, i32
  }
  func.func @transform_3(%arg0: i32) -> (i32, i32) {
    %c0_i32 = arith.constant 0 : i32
    %c0_i32_0 = arith.constant 0 : i32
    %c0_i32_1 = arith.constant 0 : i32
    return %c0_i32, %c0_i32_0 : i32, i32
  }
  func.func @transform_4(%arg0: i32) -> (i32, i32) {
    %c0_i32 = arith.constant 0 : i32
    %c0_i32_0 = arith.constant 0 : i32
    return %arg0, %c0_i32 : i32, i32
  }
}

</mosaic_0001>

<bundles_post_ra>
// kernel: tpu_custom_call.1
= control target key start
LH: loop header
LB: loop body
LE: loop exit
PB: predicated region body
PF: predicated region fallthrough
CT: control target
= control target key end

     0   :  { %9 = vsyncpa [#allocation3], 0  ;;  %s556_s0 = inlined_call_operand.hbm [shape: bf16[16,128], index: 0, kind: input, shape index: {}]   ;;  %s557_s1 = inlined_call_operand.hbm [shape: bf16[128,128], index: 1, kind: input, shape index: {}]   ;;  %s558_s2 = inlined_call_operand.hbm [shape: bf16[128,128], index: 2, kind: input, shape index: {}]   ;;  %s559_s3 = inlined_call_operand.vmem [shape: f32[1,256], index: 3, kind: input, shape index: {}]   ;;  %s560_s4 = inlined_call_operand.hbm [shape: f32[16,128], index: 4, kind: output, shape index: {}]  }
   0x1   :  { %10 = vsyncpa [#allocation6], 0 }
   0x2   :  { %11 = vsyncpa [#allocation4], 0  ;;  %s29_s17 = sshll.u32 %s557_s1, 4  ;;  %s505_s18 = smov [#allocation5]   ;;  %s30_s17 = int_to_ptr.hbm [resolvable:$true] %s29_s17 }
   0x3   :  { %s31_s19 = sshll.u32 %s505_s18, 4  ;;  %s16_s22 = sshll.u32 %s556_s0, 4  ;;  %s32_s19 = int_to_ptr.vmem [resolvable:$true] %s31_s19  ;;  %s17_s22 = int_to_ptr.hbm [resolvable:$true] %s16_s22 }
   0x4   :  { %s506_s23 = smov 64   ;;  %s507_s24 = smov 4  }
   0x5   :  { %37 = dma.hbm_to_vmem [thread:$0]  %s30_s17, 1024, %s32_s19, [#allocation6], %s506_s23, %s506_s23, %s507_s24  }
   0x6   :  { %s508_s25 = smov [#allocation2]   ;;  %s42_s29 = sshll.u32 %s558_s2, 4  ;;  %s43_s29 = int_to_ptr.hbm [resolvable:$true] %s42_s29 }
   0x7   :  { %s18_s26 = sshll.u32 %s508_s25, 4  ;;  %s509_s1 = smov [#allocation7]   ;;  %s19_s26 = int_to_ptr.vmem [resolvable:$true] %s18_s26 }
   0x8   :  { %24 = dma.hbm_to_vmem [thread:$0]  %s17_s22, 128, %s19_s26, [#allocation3], %s506_s23, %s506_s23, %s507_s24  }
   0x9   :  { %s44_s30 = sshll.u32 %s509_s1, 4  ;;  %s45_s30 = int_to_ptr.vmem [resolvable:$true] %s44_s30 }
   0xa   :  { %50 = dma.hbm_to_vmem [thread:$0]  %s43_s29, 1024, %s45_s30, [#allocation6], %s506_s23, %s506_s23, %s507_s24  }
   0xb   :  { %499 = dma.done.wait [#allocation3], 128  }
   0xc   :  { %500 = vsyncadd [#allocation3], 4294967168 }
   0xd   :  { %501 = dma.done.wait [#allocation6], 2048  }
   0xe   :  { %502 = vsyncadd [#allocation6], 4294965248  ;;  %v376_v0 = vld [vmem:[#allocation5 + $0x38] sm:$0xff]  ;;  %v375_v1 = vld [vmem:[#allocation5 + $0x30] sm:$0xff]  ;;  %s510_s7 = smov [#allocation8]   ;;  %s284_s11 = sshll.u32 %s560_s4, 4  ;;  %s285_s11 = int_to_ptr.hbm [resolvable:$true] %s284_s11 }
   0xf   :  { %141 = vmatpush.bf16.msra.mxu0 %v376_v0  ;;  %v374_v2 = vld [vmem:[#allocation5 + $0x28] sm:$0xff]  ;;  %v373_v3 = vld [vmem:[#allocation5 + $0x20] sm:$0xff]  ;;  %v372_v4 = vld [vmem:[#allocation5 + $0x18] sm:$0xff]  ;;  %s282_s8 = sshll.u32 %s510_s7, 4  ;;  %s511_s12 = smov 128   ;;  %s283_s8 = int_to_ptr.vmem [resolvable:$true] %s282_s8 }
  0x10   :  { %v371_v5 = vld [vmem:[#allocation5 + $0x10] sm:$0xff]  ;;  %v370_v6 = vld [vmem:[#allocation5 + $0x8] sm:$0xff]  ;;  %v369_v7 = vld [vmem:[#allocation5] sm:$0xff]  ;;  %s512_s13 = smov 8  }
  0x11   :  { %v368_v8 = vld [vmem:[#allocation2] sm:$0xff]  ;;  %v383_v10 = vld [vmem:[#allocation7 + $0x30] sm:$0xff]  ;;  %v382_v11 = vld [vmem:[#allocation7 + $0x28] sm:$0xff] }
  0x12   :  { %v384_v9 = vld [vmem:[#allocation7 + $0x38] sm:$0xff]  ;;  %v381_v12 = vld [vmem:[#allocation7 + $0x20] sm:$0xff]  ;;  %v379_v14 = vld [vmem:[#allocation7 + $0x10] sm:$0xff] }
  0x13   :  { %142 = vmatpush.bf16.msra.mxu0 %v375_v1  ;;  %262 = vmatpush.bf16.msra.mxu1 %v384_v9  ;;  %v380_v13 = vld [vmem:[#allocation7 + $0x18] sm:$0xff]  ;;  %v378_v16 = vld [vmem:[#allocation7 + $0x8] sm:$0xff]  ;;  %v377_v19 = vld [vmem:[#allocation7] sm:$0xff] }
  0x14   :  { %v393_v15 = vld [vmem:[%s559_s3] ss:$0 sm:$0xff]  ;;  %v394_v49 = vld [vmem:[%s559_s3 + $0x1] ss:$0 sm:$0xff] }
  0x17   :  { %143 = vmatpush.bf16.msra.mxu0 %v374_v2  ;;  %263 = vmatpush.bf16.msra.mxu1 %v383_v10 }
  0x1b   :  { %144 = vmatpush.bf16.msra.mxu0 %v373_v3  ;;  %264 = vmatpush.bf16.msra.mxu1 %v382_v11 }
  0x1f   :  { %145 = vmatpush.bf16.msra.mxu0 %v372_v4  ;;  %265 = vmatpush.bf16.msra.mxu1 %v381_v12 }
  0x23   :  { %146 = vmatpush.bf16.msra.mxu0 %v371_v5  ;;  %266 = vmatpush.bf16.msra.mxu1 %v380_v13 }
  0x27   :  { %147 = vmatpush.bf16.msra.mxu0 %v370_v6  ;;  %267 = vmatpush.bf16.msra.mxu1 %v379_v14 }
  0x2b   :  { %148 = vmatpush.bf16.msra.mxu0 %v369_v7  ;;  %268 = vmatpush.bf16.msra.mxu1 %v378_v16 }
  0x2e   :  { %149 = vmatmul.bf16.vlgmr.msra.gmra.mxu0 %v368_v8 }
  0x2f   :  { %269 = vmatpush.bf16.msra.mxu1 %v377_v19 }
  0xab   :  { %v150_v17 = vpop.f32.mrf.mxu0 }
  0xac   :  { %v151_v18 = vadd.f32 %v393_v15, %v150_v17 }
  0xae   :  { %v334_v20 = vmul.f32 -1.442695, %v151_v18 }
  0xb0   :  { %395 = vpow2.f32 %v334_v20 }
  0xb3   :  { %v152_v21 = vpop.f32.mrf.mxu0 }
  0xb4   :  { %v153_v22 = vadd.f32 %v393_v15, %v152_v21 }
  0xb6   :  { %v396_v23 = vpop.eup %395  ;;  %v335_v24 = vmul.f32 -1.442695, %v153_v22 }
  0xb7   :  { %v161_v25 = vadd.f32 1.0, %v396_v23 }
  0xb8   :  { %397 = vpow2.f32 %v335_v24 }
  0xb9   :  { %399 = vrcp.f32 %v161_v25  ;;  %vm168_vm1 = vweird.f32 %v161_v25  ;;  %v174_v36 = vand.u32 2147483648, %v161_v25  ;;  %v172_v38 = vand.u32 2147483647, %v161_v25 }
  0xbb   :  { %v175_v43 = vor.u32 1.1754944e-38, %v174_v36  ;;  %vm173_vm6 = vcmp.eq.f32.partialorder %v172_v38, 8.507059e+37 }
  0xbe   :  { %v398_v26 = vpop.eup %397 }
  0xbf   :  { %v400_v27 = vpop.eup %399  ;;  %v162_v28 = vadd.f32 1.0, %v398_v26 }
  0xc0   :  { %v164_v29 = vmul.f32 %v400_v27, %v161_v25  ;;  %vm169_vm0 = vweird.f32 %v400_v27 }
  0xc1   :  { %401 = vrcp.f32 %v162_v28  ;;  %v189_v37 = vand.u32 2147483648, %v162_v28  ;;  %v187_v40 = vand.u32 2147483647, %v162_v28  ;;  %vm170_vm3 = vmor %vm168_vm1, %vm169_vm0  ;;  %vm183_vm4 = vweird.f32 %v162_v28 }
  0xc2   :  { %v165_v30 = vsub.f32 1.0, %v164_v29 }
  0xc3   :  { %v190_v44 = vor.u32 1.1754944e-38, %v189_v37  ;;  %vm188_vm7 = vcmp.eq.f32.partialorder %v187_v40, 8.507059e+37 }
  0xc4   :  { %v166_v31 = vmul.f32 %v400_v27, %v165_v30 }
  0xc6   :  { %v167_v34 = vadd.f32 %v400_v27, %v166_v31 }
  0xc7   :  { %v402_v32 = vpop.eup %401 }
  0xc8   :  { %v179_v33 = vmul.f32 %v402_v32, %v162_v28  ;;  %vm184_vm2 = vweird.f32 %v402_v32  ;;  %v171_v41 = vsel %vm170_vm3, %v400_v27, %v167_v34 }
  0xc9   :  { %vm185_vm5 = vmor %vm183_vm4, %vm184_vm2  ;;  %v176_v46 = vsel %vm173_vm6, %v175_v43, %v171_v41 }
  0xca   :  { %v180_v35 = vsub.f32 1.0, %v179_v33 }
  0xcc   :  { %v181_v39 = vmul.f32 %v402_v32, %v180_v35 }
  0xce   :  { %v182_v42 = vadd.f32 %v402_v32, %v181_v39 }
  0xd0   :  { %v186_v45 = vsel %vm185_vm5, %v402_v32, %v182_v42 }
  0xd1   :  { %v191_v47 = vsel %vm188_vm7, %v190_v44, %v186_v45 }
  0xd2   :  { %v193_v48 = vpack.c.bf16 %v191_v47, %v176_v46 }
  0xd4   :  { %270 = vmatmul.bf16.vlgmr.msra.gmra.mxu1 %v193_v48 }
 0x151   :  { %v271_v50 = vpop.f32.mrf.mxu1 }
 0x152   :  { %v272_v51 = vadd.f32 %v394_v49, %v271_v50 }
 0x154   :  { %276 = vst [vmem:[#allocation8] sm:$0xff] %v272_v51 }
 0x159   :  { %v273_v52 = vpop.f32.mrf.mxu1 }
 0x15a   :  { %v274_v53 = vadd.f32 %v394_v49, %v273_v52 }
 0x15c   :  { %277 = vst [vmem:[#allocation8 + $0x8] sm:$0xff] %v274_v53 }
 0x15d   :  { %290 = dma.vmem_to_hbm [thread:$0]  %s283_s8, 256, %s285_s11, [#allocation4], %s511_s12, %s511_s12, %s512_s13  }
 0x15e   :  { %503 = dma.done.wait [#allocation4], 256  }
 0x15f   :  { %504 = vsyncadd [#allocation4], 4294967040 }
 0x160   :  { %295 = vsyncpa [#allocation3], 1 }
 0x161   :  { %296 = vsyncpa [#allocation6], 1 }
 0x162   :  { %297 = vsyncpa [#allocation4], 1 }

</bundles_post_ra>
